<compile_context>
chip_gen: v7x
topology: tpu7x:2x2x1
jax: 0.10.0
libtpu: 0.0.40
codegen_flags: <defaults>
</compile_context>

<pallas_src>
import jax
import jax.numpy as jnp
from jax.experimental import pallas as pl
from jax.experimental.pallas import tpu as pltpu

_LANE = 128
_SUBLANE = 8


def _round_up(v, m):
    return -(-v // m) * m


def _linear_sigmoid_kernel(x_ref, w_ref, b_ref, o_ref):
    # x_ref: (TM, Din), w_ref: (Din, Dout_p), b_ref: (1, Dout_p), o_ref: (TM, Dout_p)
    acc = jnp.dot(x_ref[...], w_ref[...], preferred_element_type=jnp.float32)
    acc = acc + b_ref[...]                       # bias broadcast over batch tile
    o_ref[...] = jax.nn.sigmoid(acc).astype(o_ref.dtype)


def _chip_params():
    """Per-generation tiling knobs. v7x: 64 MiB VMEM / 2 TCs; v5e/v6e: 128 MiB / 1 TC."""
    try:
        kind = jax.devices()[0].device_kind.lower()
    except Exception:  # pragma: no cover - e.g. interpret mode
        kind = ""
    is_v7x = "7" in kind
    vmem_cap = (40 << 20) if is_v7x else (96 << 20)
    default_tm = 512 if is_v7x else 1024
    return vmem_cap, default_tm


def prepare_linear_params(weight, bias):
    """One-time (init-time) parameter prep — do NOT call per forward.

    weight: (output_dim, input_dim) float32 (PyTorch nn.Linear layout)
    bias:   (output_dim,)           float32
    Returns (w_t, b2, dout): weight transposed to (din, dout_p) and bias as
    (1, dout_p), both lane-dense padded to a multiple of 128 output columns.
    """
    dout, din = weight.shape
    dout_p = _round_up(max(dout, _LANE), _LANE)
    w_t = jnp.asarray(weight).T                      # (din, dout) — MXU-native
    b = jnp.asarray(bias)
    if dout_p != dout:
        w_t = jnp.pad(w_t, ((0, 0), (0, dout_p - dout)))
        b = jnp.pad(b, (0, dout_p - dout))
    return w_t, b.reshape(1, dout_p), dout


def wrapper_vision_model_forward(x, w_t, b2, dout, *, tm=None):
    """Pallas equivalent of: sigmoid(x @ weight.T + bias).

    x:   (B, input_dim)        float32
    w_t: (input_dim, dout_p)   float32  (from prepare_linear_params)
    b2:  (1, dout_p)           float32  (from prepare_linear_params)
    dout: logical output_dim (<= dout_p)
    """
    B, din = x.shape
    din_w, dout_p = w_t.shape
    assert din_w == din and b2.shape == (1, dout_p)

    vmem_cap, default_tm = _chip_params()
    tm = default_tm if tm is None else tm

    if B <= tm:
        tm_eff = B                         # single block == full array dim (always legal)
        grid_m = 1
    else:
        tm_eff = tm                        # multiple of 8 sublanes
        grid_m = pl.cdiv(B, tm_eff)        # ragged last block handled by Pallas masking

    def _call(weight_buffers):
        # Grid-invariant operands: request a single buffer (nothing to
        # double-buffer since index_map is (0,0) for every step).
        wb_kwargs = dict(pipeline_mode=pl.Buffered(1)) if weight_buffers == 1 else {}
        bytes_needed = 4 * (2 * tm_eff * din                     # double-buffered x tile
                            + 2 * tm_eff * dout_p                # double-buffered out tile
                            + weight_buffers * (din * dout_p     # resident weight
                                                + dout_p))       # resident bias
        vmem_limit = int(min(max(int(1.5 * bytes_needed), 4 << 20), vmem_cap))
        return pl.pallas_call(
            _linear_sigmoid_kernel,
            out_shape=jax.ShapeDtypeStruct((B, dout_p), x.dtype),
            grid_spec=pltpu.PrefetchScalarGridSpec(
                num_scalar_prefetch=0,
                grid=(grid_m,),
                in_specs=[
                    pl.BlockSpec((tm_eff, din), lambda i: (i, 0)),              # x batch tile
                    pl.BlockSpec((din, dout_p), lambda i: (0, 0), **wb_kwargs),  # weight (resident)
                    pl.BlockSpec((1, dout_p), lambda i: (0, 0), **wb_kwargs),    # bias (resident)
                ],
                out_specs=pl.BlockSpec((tm_eff, dout_p), lambda i: (i, 0)),
            ),
            compiler_params=pltpu.CompilerParams(
                dimension_semantics=("parallel",),
                vmem_limit_bytes=vmem_limit,
            ),
        )(x, w_t, b2)

    try:
        out_p = _call(1)
    except Exception:
        # Fallback in case Buffered(1) is rejected by this jax/Mosaic version.
        out_p = _call(2)

    # Only the lane padding (if any) is sliced off; no batch-axis copy.
    return out_p if dout_p == dout else out_p[:, :dout]


def _reference(x, weight, bias):
    return jax.nn.sigmoid(x @ weight.T + bias)


if __name__ == "__main__":
    # Small shapes consistent with the module: Linear(input_dim -> output_dim).
    B, input_dim, output_dim = 8, 32, 16

    key = jax.random.PRNGKey(0)
    kx, kw, kb = jax.random.split(key, 3)

    x = jax.random.normal(kx, (B, input_dim), dtype=jnp.float32)
    # Deterministic nn.Linear-style init (uniform in +/- 1/sqrt(fan_in)).
    bound = 1.0 / jnp.sqrt(jnp.float32(input_dim))
    weight = jax.random.uniform(
        kw, (output_dim, input_dim), minval=-bound, maxval=bound,
        dtype=jnp.float32)
    bias = jax.random.uniform(
        kb, (output_dim,), minval=-bound, maxval=bound, dtype=jnp.float32)

    # One-time parameter prep (init-time), then the hot forward path.
    w_t, b2, dout = prepare_linear_params(weight, bias)
    out = wrapper_vision_model_forward(x, w_t, b2, dout)
    out = jax.block_until_ready(out)

    ref = _reference(x, weight, bias)
    assert out.shape == (B, output_dim)
    assert jnp.allclose(out, ref, atol=1e-5, rtol=1e-5), "mismatch vs reference"

    print("KERNEL_OK")
</pallas_src>

<mosaic_0001>
module attributes {stable_mosaic.version = 11 : i64} {
  func.func @_linear_sigmoid_kernel(%arg0: i32, %arg1: memref<8x32xf32, #tpu.memory_space<vmem>>, %arg2: memref<32x128xf32, #tpu.memory_space<vmem>>, %arg3: memref<1x128xf32, #tpu.memory_space<vmem>>, %arg4: memref<8x128xf32, #tpu.memory_space<vmem>>) attributes {dimension_semantics = [#tpu.dimension_semantics<parallel>], iteration_bounds = array<i64: 1>, scalar_prefetch = 0 : i64, scratch_operands = 0 : i64, tpu.core_type = #tpu.core_type<tc>, window_params = [{transform_indices = @transform_0, window_bounds = array<i64: 8, 32>}, {pipeline_mode = #tpu.pipeline_mode<synchronous>, transform_indices = @transform_1, window_bounds = array<i64: 32, 128>}, {pipeline_mode = #tpu.pipeline_mode<synchronous>, transform_indices = @transform_2, window_bounds = array<i64: 1, 128>}, {transform_indices = @transform_3, window_bounds = array<i64: 8, 128>}]} {
    %c0 = arith.constant 0 : index
    %c0_0 = arith.constant 0 : index
    %0 = vector.load %arg1[%c0, %c0_0] : memref<8x32xf32, #tpu.memory_space<vmem>>, vector<8x32xf32>
    %c0_1 = arith.constant 0 : index
    %c0_2 = arith.constant 0 : index
    %1 = vector.load %arg2[%c0_1, %c0_2] : memref<32x128xf32, #tpu.memory_space<vmem>>, vector<32x128xf32>
    %cst = arith.constant dense<0.000000e+00> : vector<8x128xf32>
    %2 = tpu.matmul %0, %1, %cst {dimension_numbers = #tpu.dot_dimension_numbers<[1], [0], [0], [1], [0, 0, 1, 1], [], []>} : vector<8x32xf32>, vector<32x128xf32>, vector<8x128xf32> -> vector<8x128xf32>
    %c0_3 = arith.constant 0 : index
    %c0_4 = arith.constant 0 : index
    %3 = vector.load %arg3[%c0_3, %c0_4] : memref<1x128xf32, #tpu.memory_space<vmem>>, vector<1x128xf32>
    %4 = vector.broadcast %3 : vector<1x128xf32> to vector<8x128xf32>
    %5 = arith.addf %2, %4 : vector<8x128xf32>
    %6 = arith.negf %5 : vector<8x128xf32>
    %7 = math.exp %6 : vector<8x128xf32>
    %cst_5 = arith.constant 1.000000e+00 : f32
    %8 = vector.broadcast %cst_5 : f32 to vector<8x128xf32>
    %9 = arith.addf %8, %7 : vector<8x128xf32>
    %10 = arith.divf %8, %9 : vector<8x128xf32>
    %c0_6 = arith.constant 0 : index
    %c0_7 = arith.constant 0 : index
    %11 = vector.load %arg4[%c0_6, %c0_7] : memref<8x128xf32, #tpu.memory_space<vmem>>, vector<8x128xf32>
    tpu.vector_store %arg4[%c0_6, %c0_7], %10 {strides = array<i32>} : memref<8x128xf32, #tpu.memory_space<vmem>>, vector<8x128xf32>,
    return
  }
  func.func @transform_0(%arg0: i32) -> (i32, i32) {
    %c0_i32 = arith.constant 0 : i32
    %c0_i32_0 = arith.constant 0 : i32
    return %arg0, %c0_i32 : i32, i32
  }
  func.func @transform_1(%arg0: i32) -> (i32, i32) {
    %c0_i32 = arith.constant 0 : i32
    %c0_i32_0 = arith.constant 0 : i32
    %c0_i32_1 = arith.constant 0 : i32
    return %c0_i32, %c0_i32_0 : i32, i32
  }
  func.func @transform_2(%arg0: i32) -> (i32, i32) {
    %c0_i32 = arith.constant 0 : i32
    %c0_i32_0 = arith.constant 0 : i32
    %c0_i32_1 = arith.constant 0 : i32
    return %c0_i32, %c0_i32_0 : i32, i32
  }
  func.func @transform_3(%arg0: i32) -> (i32, i32) {
    %c0_i32 = arith.constant 0 : i32
    %c0_i32_0 = arith.constant 0 : i32
    return %arg0, %c0_i32 : i32, i32
  }
}

module attributes {stable_mosaic.version = 11 : i64} {
  func.func @_linear_sigmoid_kernel(%arg0: i32, %arg1: memref<8x32xf32, #tpu.memory_space<vmem>>, %arg2: memref<32x128xf32, #tpu.memory_space<vmem>>, %arg3: memref<1x128xf32, #tpu.memory_space<vmem>>, %arg4: memref<8x128xf32, #tpu.memory_space<vmem>>) attributes {dimension_semantics = [#tpu.dimension_semantics<parallel>], iteration_bounds = array<i64: 1>, scalar_prefetch = 0 : i64, scratch_operands = 0 : i64, tpu.core_type = #tpu.core_type<tc>, window_params = [{transform_indices = @transform_0, window_bounds = array<i64: 8, 32>}, {pipeline_mode = #tpu.pipeline_mode<synchronous>, transform_indices = @transform_1, window_bounds = array<i64: 32, 128>}, {pipeline_mode = #tpu.pipeline_mode<synchronous>, transform_indices = @transform_2, window_bounds = array<i64: 1, 128>}, {transform_indices = @transform_3, window_bounds = array<i64: 8, 128>}]} {
    %c0 = arith.constant 0 : index
    %c0_0 = arith.constant 0 : index
    %0 = vector.load %arg1[%c0, %c0_0] : memref<8x32xf32, #tpu.memory_space<vmem>>, vector<8x32xf32>
    %c0_1 = arith.constant 0 : index
    %c0_2 = arith.constant 0 : index
    %1 = vector.load %arg2[%c0_1, %c0_2] : memref<32x128xf32, #tpu.memory_space<vmem>>, vector<32x128xf32>
    %cst = arith.constant dense<0.000000e+00> : vector<8x128xf32>
    %2 = tpu.matmul %0, %1, %cst {dimension_numbers = #tpu.dot_dimension_numbers<[1], [0], [0], [1], [0, 0, 1, 1], [], []>} : vector<8x32xf32>, vector<32x128xf32>, vector<8x128xf32> -> vector<8x128xf32>
    %c0_3 = arith.constant 0 : index
    %c0_4 = arith.constant 0 : index
    %3 = vector.load %arg3[%c0_3, %c0_4] : memref<1x128xf32, #tpu.memory_space<vmem>>, vector<1x128xf32>
    %4 = vector.broadcast %3 : vector<1x128xf32> to vector<8x128xf32>
    %5 = arith.addf %2, %4 : vector<8x128xf32>
    %6 = arith.negf %5 : vector<8x128xf32>
    %7 = math.exp %6 : vector<8x128xf32>
    %cst_5 = arith.constant 1.000000e+00 : f32
    %8 = vector.broadcast %cst_5 : f32 to vector<8x128xf32>
    %9 = arith.addf %8, %7 : vector<8x128xf32>
    %10 = arith.divf %8, %9 : vector<8x128xf32>
    %c0_6 = arith.constant 0 : index
    %c0_7 = arith.constant 0 : index
    %11 = vector.load %arg4[%c0_6, %c0_7] : memref<8x128xf32, #tpu.memory_space<vmem>>, vector<8x128xf32>
    tpu.vector_store %arg4[%c0_6, %c0_7], %10 {strides = array<i32>} : memref<8x128xf32, #tpu.memory_space<vmem>>, vector<8x128xf32>,
    return
  }
  func.func @transform_0(%arg0: i32) -> (i32, i32) {
    %c0_i32 = arith.constant 0 : i32
    %c0_i32_0 = arith.constant 0 : i32
    return %arg0, %c0_i32 : i32, i32
  }
  func.func @transform_1(%arg0: i32) -> (i32, i32) {
    %c0_i32 = arith.constant 0 : i32
    %c0_i32_0 = arith.constant 0 : i32
    %c0_i32_1 = arith.constant 0 : i32
    return %c0_i32, %c0_i32_0 : i32, i32
  }
  func.func @transform_2(%arg0: i32) -> (i32, i32) {
    %c0_i32 = arith.constant 0 : i32
    %c0_i32_0 = arith.constant 0 : i32
    %c0_i32_1 = arith.constant 0 : i32
    return %c0_i32, %c0_i32_0 : i32, i32
  }
  func.func @transform_3(%arg0: i32) -> (i32, i32) {
    %c0_i32 = arith.constant 0 : i32
    %c0_i32_0 = arith.constant 0 : i32
    return %arg0, %c0_i32 : i32, i32
  }
}

</mosaic_0001>

<bundles_post_ra>
// kernel: tpu_custom_call.1
= control target key start
LH: loop header
LB: loop body
LE: loop exit
PB: predicated region body
PF: predicated region fallthrough
CT: control target
= control target key end

     0   :  { %8 = vsyncpa [#allocation3], 0  ;;  %s333_s0 = inlined_call_operand.hbm [shape: f32[8,32], index: 0, kind: input, shape index: {}]   ;;  %s334_s1 = inlined_call_operand.hbm [shape: f32[32,128], index: 1, kind: input, shape index: {}]   ;;  %s335_s2 = inlined_call_operand.vmem [shape: f32[1,128], index: 2, kind: input, shape index: {}]   ;;  %s336_s3 = inlined_call_operand.hbm [shape: f32[8,128], index: 3, kind: output, shape index: {}]  }
   0x1   :  { %9 = vsyncpa [#allocation6], 0 }
   0x2   :  { %10 = vsyncpa [#allocation4], 0  ;;  %s259_s12 = smov [#allocation2]   ;;  %s260_s14 = smov [#allocation5]  }
   0x3   :  { %s17_s13 = sshll.u32 %s259_s12, 4  ;;  %s26_s15 = sshll.u32 %s260_s14, 4  ;;  %s18_s13 = int_to_ptr.vmem [resolvable:$true] %s17_s13  ;;  %s287_s15 = int_to_ptr.vmem [resolvable:$true] %s26_s15 }
   0x4   :  { %s187_s18 = scalar_lea.hbm %s333_s0, 128 }
   0x5   :  { %p188_p0 = scmp.ne.s32.totalorder %s333_s0, %s187_s18  ;;  %p191_p1 = scmp.lt.u32.totalorder %s187_s18, %s333_s0 }
   0x7   :  { %p193_p2 = pnand %p191_p1, %p188_p0 }
   0x9   :  { %196 = shalt.err (!%p193_p2)
}
   0xa   :  { %s197_s23 = scalar_lea.vmem %s18_s13, 128  ;;  %p202_p4 = scmp.lt.s32.totalorder %s18_s13, %s18_s13 }
   0xb   :  { %p198_p3 = scmp.ne.s32.totalorder %s18_s13, %s197_s23  ;;  %p203_p5 = scmp.lt.s32.totalorder %s197_s23, %s197_s23 }
   0xd   :  { %p204_p6 = por %p203_p5, %p202_p4 }
   0xf   :  { %p205_p7 = pnand %p204_p6, %p198_p3 }
  0x11   :  { %208 = shalt.err (!%p205_p7)
}
  0x12   :  { %20 = dma.hbm_to_vmem [thread:$0]  %s333_s0, 128, %s18_s13, [#allocation3]  }
  0x13   :  { %s209_s28 = scalar_lea.hbm %s334_s1, 512 }
  0x14   :  { %p210_p8 = scmp.ne.s32.totalorder %s334_s1, %s209_s28  ;;  %p213_p9 = scmp.lt.u32.totalorder %s209_s28, %s334_s1 }
  0x16   :  { %p215_p10 = pnand %p213_p9, %p210_p8 }
  0x18   :  { %218 = shalt.err (!%p215_p10)
}
  0x19   :  { %s219_s6 = scalar_lea.vmem %s287_s15, 512  ;;  %p224_p12 = scmp.lt.s32.totalorder %s287_s15, %s287_s15 }
  0x1a   :  { %p220_p11 = scmp.ne.s32.totalorder %s287_s15, %s219_s6  ;;  %p225_p13 = scmp.lt.s32.totalorder %s219_s6, %s219_s6 }
  0x1c   :  { %p226_p0 = por %p225_p13, %p224_p12 }
  0x1e   :  { %p227_p1 = pnand %p226_p0, %p220_p11 }
  0x20   :  { %230 = shalt.err (!%p227_p1)
}
  0x21   :  { %s261_s0 = smov 128   ;;  %s262_s7 = smov 8  }
  0x22   :  { %32 = dma.hbm_to_vmem [thread:$0]  %s334_s1, 512, %s287_s15, [#allocation6], %s261_s0, %s261_s0, %s262_s7  }
  0x23   :  { %253 = dma.done.wait [#allocation3], 128  }
  0x24   :  { %254 = vsyncadd [#allocation3], 4294967168 }
  0x25   :  { %255 = dma.done.wait [#allocation6], 512  }
  0x26   :  { %256 = vsyncadd [#allocation6], 4294966784  ;;  %v263_v0 = vmov 0.0|0.0   ;;  %vm264_vm0 = vmmov 0   ;;  %v265_v1 = vmov 0.0   ;;  %v42_v2 = vld [vmem:[#allocation5] sm:$0xff] }
  0x27   :  { %169 = vmatprep.subr.bf16.mxu0 %v263_v0  ;;  %166 = vmatprep.mubr.msk.f32.mxu0 %vm264_vm0, %v265_v1  ;;  %v43_v3 = vld [vmem:[#allocation5 + $0x8] sm:$0xff]  ;;  %v44_v4 = vld [vmem:[#allocation5 + $0x10] sm:$0xff]  ;;  %v45_v6 = vld [vmem:[#allocation5 + $0x18] sm:$0xff]  ;;  %vm53_vm1 = vcmask 261120   ;;  %s266_s11 = smov [#allocation7]  }
  0x28   :  { %v170_v5 = vpack.c.bf16 %v43_v3, %v42_v2  ;;  %v173_v7 = vpack.c.bf16 %v45_v6, %v44_v4  ;;  %v41_v8 = vld [vmem:[#allocation2] sm:$0xff]  ;;  %s140_s12 = sshll.u32 %s266_s11, 4  ;;  %s141_s12 = int_to_ptr.vmem [resolvable:$true] %s140_s12 }
  0x29   :  { %v150_v9 = vld [vmem:[%s335_s2] ss:$0 sm:$0xff]  ;;  %s231_s13 = scalar_lea.vmem %s141_s12, 128  ;;  %p236_p3 = scmp.lt.s32.totalorder %s141_s12, %s141_s12 }
  0x2a   :  { %171 = vmatpush3.bf16.msra.mxu0 %v170_v5  ;;  %p232_p2 = scmp.ne.s32.totalorder %s141_s12, %s231_s13  ;;  %p237_p4 = scmp.lt.s32.totalorder %s231_s13, %s231_s13 }
  0x2b   :  { %172 = vmatprep.subr.bf16.mxu0 %v263_v0 }
  0x2c   :  { %p238_p5 = por %p237_p4, %p236_p3 }
  0x2e   :  { %174 = vmatpush3.bf16.msra.mxu0 %v173_v7  ;;  %p239_p6 = pnand %p238_p5, %p232_p2 }
  0x31   :  { %167 = vmatmul.mubr.msk.f32.vlgmr.msra.gmra.mrb[0].mxu0 %vm53_vm1, %v41_v8 }
 0x104   :  { %v123_v10 = vpop.f32.mrb[0].mxu0 }
 0x105   :  { %v124_v11 = vadd.f32 %v150_v9, %v123_v10  ;;  %v168_v12 = vpop.f32.mrb[1].mxu0 }
 0x107   :  { %v152_v13 = vmul.f32 -1.442695, %v124_v11 }
 0x109   :  { %183 = vpow2.f32 %v152_v13 }
 0x113   :  { %v184_v14 = vpop.eup %183 }
 0x114   :  { %v130_v15 = vadd.f32 1.0, %v184_v14 }
 0x116   :  { %185 = vrcp.f32 %v130_v15 }
 0x120   :  { %v186_v16 = vpop.eup %185 }
 0x121   :  { %133 = vst [vmem:[#allocation7] sm:$0xff] %v186_v16 }
 0x122   :  { %242 = shalt.err (!%p239_p6)
}
 0x123   :  { %s243_s15 = scalar_lea.hbm %s336_s3, 128 }
 0x124   :  { %p244_p7 = scmp.ne.s32.totalorder %s336_s3, %s243_s15  ;;  %p247_p8 = scmp.lt.u32.totalorder %s243_s15, %s336_s3 }
 0x126   :  { %p249_p9 = pnand %p247_p8, %p244_p7 }
 0x128   :  { %252 = shalt.err (!%p249_p9)
}
 0x129   :  { %143 = dma.vmem_to_hbm [thread:$0]  %s141_s12, 128, %s336_s3, [#allocation4]  }
 0x12a   :  { %257 = dma.done.wait [#allocation4], 128  }
 0x12b   :  { %258 = vsyncadd [#allocation4], 4294967168 }
 0x12c   :  { %147 = vsyncpa [#allocation3], 1 }
 0x12d   :  { %148 = vsyncpa [#allocation6], 1 }
 0x12e   :  { %149 = vsyncpa [#allocation4], 1 }

// kernel: tpu_custom_call.1
= control target key start
LH: loop header
LB: loop body
LE: loop exit
PB: predicated region body
PF: predicated region fallthrough
CT: control target
= control target key end

     0   :  { %8 = vsyncpa [#allocation3], 0  ;;  %s333_s0 = inlined_call_operand.hbm [shape: f32[8,32], index: 0, kind: input, shape index: {}]   ;;  %s334_s1 = inlined_call_operand.hbm [shape: f32[32,128], index: 1, kind: input, shape index: {}]   ;;  %s335_s2 = inlined_call_operand.vmem [shape: f32[1,128], index: 2, kind: input, shape index: {}]   ;;  %s336_s3 = inlined_call_operand.hbm [shape: f32[8,128], index: 3, kind: output, shape index: {}]  }
   0x1   :  { %9 = vsyncpa [#allocation6], 0 }
   0x2   :  { %10 = vsyncpa [#allocation4], 0  ;;  %s259_s12 = smov [#allocation2]   ;;  %s260_s14 = smov [#allocation5]  }
   0x3   :  { %s17_s13 = sshll.u32 %s259_s12, 4  ;;  %s26_s15 = sshll.u32 %s260_s14, 4  ;;  %s18_s13 = int_to_ptr.vmem [resolvable:$true] %s17_s13  ;;  %s287_s15 = int_to_ptr.vmem [resolvable:$true] %s26_s15 }
   0x4   :  { %s187_s18 = scalar_lea.hbm %s333_s0, 128 }
   0x5   :  { %p188_p0 = scmp.ne.s32.totalorder %s333_s0, %s187_s18  ;;  %p191_p1 = scmp.lt.u32.totalorder %s187_s18, %s333_s0 }
   0x7   :  { %p193_p2 = pnand %p191_p1, %p188_p0 }
   0x9   :  { %196 = shalt.err (!%p193_p2)
}
   0xa   :  { %s197_s23 = scalar_lea.vmem %s18_s13, 128  ;;  %p202_p4 = scmp.lt.s32.totalorder %s18_s13, %s18_s13 }
   0xb   :  { %p198_p3 = scmp.ne.s32.totalorder %s18_s13, %s197_s23  ;;  %p203_p5 = scmp.lt.s32.totalorder %s197_s23, %s197_s23 }
   0xd   :  { %p204_p6 = por %p203_p5, %p202_p4 }
   0xf   :  { %p205_p7 = pnand %p204_p6, %p198_p3 }
  0x11   :  { %208 = shalt.err (!%p205_p7)
}
  0x12   :  { %20 = dma.hbm_to_vmem [thread:$0]  %s333_s0, 128, %s18_s13, [#allocation3]  }
  0x13   :  { %s209_s28 = scalar_lea.hbm %s334_s1, 512 }
  0x14   :  { %p210_p8 = scmp.ne.s32.totalorder %s334_s1, %s209_s28  ;;  %p213_p9 = scmp.lt.u32.totalorder %s209_s28, %s334_s1 }
  0x16   :  { %p215_p10 = pnand %p213_p9, %p210_p8 }
  0x18   :  { %218 = shalt.err (!%p215_p10)
}
  0x19   :  { %s219_s6 = scalar_lea.vmem %s287_s15, 512  ;;  %p224_p12 = scmp.lt.s32.totalorder %s287_s15, %s287_s15 }
  0x1a   :  { %p220_p11 = scmp.ne.s32.totalorder %s287_s15, %s219_s6  ;;  %p225_p13 = scmp.lt.s32.totalorder %s219_s6, %s219_s6 }
  0x1c   :  { %p226_p0 = por %p225_p13, %p224_p12 }
  0x1e   :  { %p227_p1 = pnand %p226_p0, %p220_p11 }
  0x20   :  { %230 = shalt.err (!%p227_p1)
}
  0x21   :  { %s261_s0 = smov 128   ;;  %s262_s7 = smov 8  }
  0x22   :  { %32 = dma.hbm_to_vmem [thread:$0]  %s334_s1, 512, %s287_s15, [#allocation6], %s261_s0, %s261_s0, %s262_s7  }
  0x23   :  { %253 = dma.done.wait [#allocation3], 128  }
  0x24   :  { %254 = vsyncadd [#allocation3], 4294967168 }
  0x25   :  { %255 = dma.done.wait [#allocation6], 512  }
  0x26   :  { %256 = vsyncadd [#allocation6], 4294966784  ;;  %v263_v0 = vmov 0.0|0.0   ;;  %vm264_vm0 = vmmov 0   ;;  %v265_v1 = vmov 0.0   ;;  %v42_v2 = vld [vmem:[#allocation5] sm:$0xff] }
  0x27   :  { %169 = vmatprep.subr.bf16.mxu0 %v263_v0  ;;  %166 = vmatprep.mubr.msk.f32.mxu0 %vm264_vm0, %v265_v1  ;;  %v43_v3 = vld [vmem:[#allocation5 + $0x8] sm:$0xff]  ;;  %v44_v4 = vld [vmem:[#allocation5 + $0x10] sm:$0xff]  ;;  %v45_v6 = vld [vmem:[#allocation5 + $0x18] sm:$0xff]  ;;  %vm53_vm1 = vcmask 261120   ;;  %s266_s11 = smov [#allocation7]  }
  0x28   :  { %v170_v5 = vpack.c.bf16 %v43_v3, %v42_v2  ;;  %v173_v7 = vpack.c.bf16 %v45_v6, %v44_v4  ;;  %v41_v8 = vld [vmem:[#allocation2] sm:$0xff]  ;;  %s140_s12 = sshll.u32 %s266_s11, 4  ;;  %s141_s12 = int_to_ptr.vmem [resolvable:$true] %s140_s12 }
  0x29   :  { %v150_v9 = vld [vmem:[%s335_s2] ss:$0 sm:$0xff]  ;;  %s231_s13 = scalar_lea.vmem %s141_s12, 128  ;;  %p236_p3 = scmp.lt.s32.totalorder %s141_s12, %s141_s12 }
  0x2a   :  { %171 = vmatpush3.bf16.msra.mxu0 %v170_v5  ;;  %p232_p2 = scmp.ne.s32.totalorder %s141_s12, %s231_s13  ;;  %p237_p4 = scmp.lt.s32.totalorder %s231_s13, %s231_s13 }
  0x2b   :  { %172 = vmatprep.subr.bf16.mxu0 %v263_v0 }
  0x2c   :  { %p238_p5 = por %p237_p4, %p236_p3 }
  0x2e   :  { %174 = vmatpush3.bf16.msra.mxu0 %v173_v7  ;;  %p239_p6 = pnand %p238_p5, %p232_p2 }
  0x31   :  { %167 = vmatmul.mubr.msk.f32.vlgmr.msra.gmra.mrb[0].mxu0 %vm53_vm1, %v41_v8 }
 0x104   :  { %v123_v10 = vpop.f32.mrb[0].mxu0 }
 0x105   :  { %v124_v11 = vadd.f32 %v150_v9, %v123_v10  ;;  %v168_v12 = vpop.f32.mrb[1].mxu0 }
 0x107   :  { %v152_v13 = vmul.f32 -1.442695, %v124_v11 }
 0x109   :  { %183 = vpow2.f32 %v152_v13 }
 0x113   :  { %v184_v14 = vpop.eup %183 }
 0x114   :  { %v130_v15 = vadd.f32 1.0, %v184_v14 }
 0x116   :  { %185 = vrcp.f32 %v130_v15 }
 0x120   :  { %v186_v16 = vpop.eup %185 }
 0x121   :  { %133 = vst [vmem:[#allocation7] sm:$0xff] %v186_v16 }
 0x122   :  { %242 = shalt.err (!%p239_p6)
}
 0x123   :  { %s243_s15 = scalar_lea.hbm %s336_s3, 128 }
 0x124   :  { %p244_p7 = scmp.ne.s32.totalorder %s336_s3, %s243_s15  ;;  %p247_p8 = scmp.lt.u32.totalorder %s243_s15, %s336_s3 }
 0x126   :  { %p249_p9 = pnand %p247_p8, %p244_p7 }
 0x128   :  { %252 = shalt.err (!%p249_p9)
}
 0x129   :  { %143 = dma.vmem_to_hbm [thread:$0]  %s141_s12, 128, %s336_s3, [#allocation4]  }
 0x12a   :  { %257 = dma.done.wait [#allocation4], 128  }
 0x12b   :  { %258 = vsyncadd [#allocation4], 4294967168 }
 0x12c   :  { %147 = vsyncpa [#allocation3], 1 }
 0x12d   :  { %148 = vsyncpa [#allocation6], 1 }
 0x12e   :  { %149 = vsyncpa [#allocation4], 1 }

</bundles_post_ra>
